<compile_context>
chip_gen: v5e
topology: v5e:2x2
jax: 0.10.0
libtpu: 0.0.40
codegen_flags: <defaults>
</compile_context>

<pallas_src>
import jax
import jax.numpy as jnp
from jax.experimental import pallas as pl
from jax.experimental.pallas import tpu as pltpu


def graph_embedder_kernel(x_ref, w1_ref, b1_ref, w2_ref, b2_ref,
                          w3_ref, b3_ref, o_ref):
    # x_ref block: (Bt, N, Cin) bf16 -- Bt batch graphs per grid step.
    Bt, N, Cin = x_ref.shape
    Cp = o_ref.shape[-1]                       # Cout padded to a 128 multiple

    # Layer 1 feature transform on all Bt*N nodes at once (fills MXU M dim).
    x = x_ref[...].reshape(Bt * N, Cin)                                  # bf16
    t1 = jnp.dot(x, w1_ref[...], preferred_element_type=jnp.float32)    # (Bt*N, H1) f32

    # Complete-graph GCN aggregation == per-graph mean over the node axis.
    m = jnp.mean(t1.reshape(Bt, N, -1), axis=1) + b1_ref[...]           # (Bt, H1) f32

    # After layer 1 all nodes of a graph are identical -> propagate only the
    # Bt unique rows through layers 2 and 3 (aggregation over identical rows
    # is the identity, exactly).
    m = jnp.dot(m.astype(jnp.bfloat16), w2_ref[...],
                preferred_element_type=jnp.float32) + b2_ref[...]       # (Bt, H2)
    m = jnp.dot(m.astype(jnp.bfloat16), w3_ref[...],
                preferred_element_type=jnp.float32) + b3_ref[...]       # (Bt, Cp)

    # Broadcast each graph's row back to all N nodes; Cp % 128 == 0 so this
    # store is lane-dense.
    o_ref[...] = jnp.broadcast_to(m[:, None, :], (Bt, N, Cp))


def _padded_tile_bytes(shape, dtype):
    """Rough VMEM footprint of one block, incl. (sublane, 128-lane) padding."""
    itemsize = jnp.dtype(dtype).itemsize
    sublane = 8 * (4 // itemsize)              # 8 rows for f32, 16 for bf16
    r = shape[-2] if len(shape) >= 2 else 1
    c = shape[-1]
    lead = 1
    for d in shape[:-2]:
        lead *= d
    rp = -(-r // sublane) * sublane
    cp = -(-c // 128) * 128
    return lead * rp * cp * itemsize


def graph_embedder(x, w1, b1, w2, b2, w3, b3, *, batch_block=1):
    """x: (B, N, Cin) float.  w_i: (out_i, in_i) GCNConv linear weights (PyG
    layout), b_i: (out_i,) biases.  Returns (B, N, Cout) float32."""
    B, N, Cin = x.shape
    H1, H2, Cout = w1.shape[0], w2.shape[0], w3.shape[0]
    Bt = batch_block
    assert B % Bt == 0, "batch_block must divide the batch size"

    # Lane-dense output: pad the final channel dim up to a multiple of 128 and
    # slice it off after the call.
    Cp = ((Cout + 127) // 128) * 128

    # bf16 matmul operands (halves HBM traffic of the dominant x stream and
    # feeds the MXU natively); biases and all accumulation stay f32.
    xb = x.astype(jnp.bfloat16)
    w1t = jnp.transpose(w1).astype(jnp.bfloat16)                        # (Cin, H1)
    w2t = jnp.transpose(w2).astype(jnp.bfloat16)                        # (H1, H2)
    w3t = jnp.zeros((H2, Cp), jnp.bfloat16).at[:, :Cout].set(
        jnp.transpose(w3).astype(jnp.bfloat16))                         # (H2, Cp)
    b1r = b1.reshape(1, H1).astype(jnp.float32)
    b2r = b2.reshape(1, H2).astype(jnp.float32)
    b3r = jnp.zeros((1, Cp), jnp.float32).at[:, :Cout].set(b3.astype(jnp.float32))

    # Explicit VMEM budget from padded tile sizes (x/out double-buffered,
    # weights/biases resident, plus headroom for the f32 intermediates).
    io_blocks = [((Bt, N, Cin), jnp.bfloat16), ((Bt, N, Cp), jnp.float32),
                 ((Cin, H1), jnp.bfloat16), ((1, H1), jnp.float32),
                 ((H1, H2), jnp.bfloat16), ((1, H2), jnp.float32),
                 ((H2, Cp), jnp.bfloat16), ((1, Cp), jnp.float32)]
    io_bytes = sum(2 * _padded_tile_bytes(s, d) for s, d in io_blocks)
    scratch_bytes = 4 * _padded_tile_bytes((Bt * N, max(H1, H2, Cp)), jnp.float32)
    vmem_limit = int(min(64 * 2**20, max(32 * 2**20, 4 * (io_bytes + scratch_bytes))))

    out = pl.pallas_call(
        graph_embedder_kernel,
        out_shape=jax.ShapeDtypeStruct((B, N, Cp), jnp.float32),
        grid_spec=pltpu.PrefetchScalarGridSpec(
            num_scalar_prefetch=0,
            grid=(B // Bt,),
            in_specs=[
                pl.BlockSpec((Bt, N, Cin), lambda b: (b, 0, 0)),   # x
                pl.BlockSpec((Cin, H1), lambda b: (0, 0)),         # W1^T
                pl.BlockSpec((1, H1), lambda b: (0, 0)),           # b1
                pl.BlockSpec((H1, H2), lambda b: (0, 0)),          # W2^T
                pl.BlockSpec((1, H2), lambda b: (0, 0)),           # b2
                pl.BlockSpec((H2, Cp), lambda b: (0, 0)),          # W3^T (Cout padded)
                pl.BlockSpec((1, Cp), lambda b: (0, 0)),           # b3   (Cout padded)
            ],
            out_specs=pl.BlockSpec((Bt, N, Cp), lambda b: (b, 0, 0)),
        ),
        compiler_params=pltpu.CompilerParams(
            dimension_semantics=("parallel",),
            vmem_limit_bytes=vmem_limit,
        ),
    )(xb, w1t, b1r, w2t, b2r, w3t, b3r)

    return out[:, :, :Cout]


def _reference(x, w1, b1, w2, b2, w3, b3):
    """Pure-JAX (f32) mirror of the PyTorch forward: three PyG GCNConv layers
    on the complete graph A = ones - eye, default add_self_loops + sym norm."""
    B, N, _ = x.shape
    a_hat = jnp.ones((N, N), jnp.float32)                # (ones - eye) + eye
    dinv = 1.0 / jnp.sqrt(jnp.sum(a_hat, axis=1))
    a_norm = dinv[:, None] * a_hat * dinv[None, :]
    h = x.astype(jnp.float32)
    for w, b in ((w1, b1), (w2, b2), (w3, b3)):
        h = jnp.einsum('ij,bjh->bih', a_norm,
                       jnp.einsum('bnc,hc->bnh', h, w)) + b
    return h


if __name__ == "__main__":
    B, nodes, input_dim, output_dim = 2, 16, 4, 32
    hidden = input_dim * 2

    key = jax.random.PRNGKey(0)
    kx, kw1, kb1, kw2, kb2, kw3, kb3 = jax.random.split(key, 7)

    x = jax.random.normal(kx, (B, nodes, input_dim), jnp.float32)

    # GCNConv linear weights (out, in) with glorot-ish scale, plus biases.
    w1 = jax.random.normal(kw1, (hidden, input_dim), jnp.float32) / jnp.sqrt(input_dim)
    b1 = 0.1 * jax.random.normal(kb1, (hidden,), jnp.float32)
    w2 = jax.random.normal(kw2, (hidden, hidden), jnp.float32) / jnp.sqrt(hidden)
    b2 = 0.1 * jax.random.normal(kb2, (hidden,), jnp.float32)
    w3 = jax.random.normal(kw3, (output_dim, hidden), jnp.float32) / jnp.sqrt(hidden)
    b3 = 0.1 * jax.random.normal(kb3, (output_dim,), jnp.float32)

    out = graph_embedder(x, w1, b1, w2, b2, w3, b3)
    jax.block_until_ready(out)

    ref = _reference(x, w1, b1, w2, b2, w3, b3)
    assert out.shape == (B, nodes, output_dim), out.shape
    # bf16 matmul operands in the kernel vs an all-f32 reference -> loose tol.
    assert jnp.allclose(out, ref, atol=5e-2, rtol=5e-2), \
        float(jnp.max(jnp.abs(out - ref)))

    print("KERNEL_OK")
</pallas_src>

<mosaic_0001>
module attributes {stable_mosaic.version = 11 : i64} {
  func.func @graph_embedder_kernel(%arg0: i32, %arg1: memref<1x16x4xbf16, #tpu.memory_space<vmem>>, %arg2: memref<4x8xbf16, #tpu.memory_space<vmem>>, %arg3: memref<1x8xf32, #tpu.memory_space<vmem>>, %arg4: memref<8x8xbf16, #tpu.memory_space<vmem>>, %arg5: memref<1x8xf32, #tpu.memory_space<vmem>>, %arg6: memref<8x128xbf16, #tpu.memory_space<vmem>>, %arg7: memref<1x128xf32, #tpu.memory_space<vmem>>, %arg8: memref<1x16x128xf32, #tpu.memory_space<vmem>>) attributes {dimension_semantics = [#tpu.dimension_semantics<parallel>], iteration_bounds = array<i64: 2>, scalar_prefetch = 0 : i64, scratch_operands = 0 : i64, tpu.core_type = #tpu.core_type<tc>, window_params = [{transform_indices = @transform_0, window_bounds = array<i64: 1, 16, 4>}, {pipeline_mode = #tpu.pipeline_mode<synchronous>, transform_indices = @transform_1, window_bounds = array<i64: 4, 8>}, {pipeline_mode = #tpu.pipeline_mode<synchronous>, transform_indices = @transform_2, window_bounds = array<i64: 1, 8>}, {pipeline_mode = #tpu.pipeline_mode<synchronous>, transform_indices = @transform_3, window_bounds = array<i64: 8, 8>}, {pipeline_mode = #tpu.pipeline_mode<synchronous>, transform_indices = @transform_4, window_bounds = array<i64: 1, 8>}, {pipeline_mode = #tpu.pipeline_mode<synchronous>, transform_indices = @transform_5, window_bounds = array<i64: 8, 128>}, {pipeline_mode = #tpu.pipeline_mode<synchronous>, transform_indices = @transform_6, window_bounds = array<i64: 1, 128>}, {transform_indices = @transform_7, window_bounds = array<i64: 1, 16, 128>}]} {
    %c0 = arith.constant 0 : index
    %c0_0 = arith.constant 0 : index
    %c0_1 = arith.constant 0 : index
    %0 = vector.load %arg1[%c0, %c0_0, %c0_1] : memref<1x16x4xbf16, #tpu.memory_space<vmem>>, vector<1x16x4xbf16>
    %1 = vector.shape_cast %0 : vector<1x16x4xbf16> to vector<16x4xbf16>
    %c0_2 = arith.constant 0 : index
    %c0_3 = arith.constant 0 : index
    %2 = vector.load %arg2[%c0_2, %c0_3] : memref<4x8xbf16, #tpu.memory_space<vmem>>, vector<4x8xbf16>
    %cst = arith.constant dense<0.000000e+00> : vector<16x8xf32>
    %3 = tpu.matmul %1, %2, %cst {dimension_numbers = #tpu.dot_dimension_numbers<[1], [0], [0], [1], [0, 0, 1, 1], [], []>} : vector<16x4xbf16>, vector<4x8xbf16>, vector<16x8xf32> -> vector<16x8xf32>
    %4 = vector.shape_cast %3 : vector<16x8xf32> to vector<1x16x8xf32>
    %cst_4 = arith.constant dense<0.000000e+00> : vector<1x8xf32>
    %5 = vector.multi_reduction <add>, %4, %cst_4 [1] : vector<1x16x8xf32> to vector<1x8xf32>
    %cst_5 = arith.constant 1.600000e+01 : f32
    %6 = vector.broadcast %cst_5 : f32 to vector<1x8xf32>
    %7 = arith.divf %5, %6 : vector<1x8xf32>
    %c0_6 = arith.constant 0 : index
    %c0_7 = arith.constant 0 : index
    %8 = vector.load %arg3[%c0_6, %c0_7] : memref<1x8xf32, #tpu.memory_space<vmem>>, vector<1x8xf32>
    %9 = arith.addf %7, %8 : vector<1x8xf32>
    %10 = arith.truncf %9 : vector<1x8xf32> to vector<1x8xbf16>
    %c0_8 = arith.constant 0 : index
    %c0_9 = arith.constant 0 : index
    %11 = vector.load %arg4[%c0_8, %c0_9] : memref<8x8xbf16, #tpu.memory_space<vmem>>, vector<8x8xbf16>
    %cst_10 = arith.constant dense<0.000000e+00> : vector<1x8xf32>
    %12 = tpu.matmul %10, %11, %cst_10 {dimension_numbers = #tpu.dot_dimension_numbers<[1], [0], [0], [1], [0, 0, 1, 1], [], []>} : vector<1x8xbf16>, vector<8x8xbf16>, vector<1x8xf32> -> vector<1x8xf32>
    %c0_11 = arith.constant 0 : index
    %c0_12 = arith.constant 0 : index
    %13 = vector.load %arg5[%c0_11, %c0_12] : memref<1x8xf32, #tpu.memory_space<vmem>>, vector<1x8xf32>
    %14 = arith.addf %12, %13 : vector<1x8xf32>
    %15 = arith.truncf %14 : vector<1x8xf32> to vector<1x8xbf16>
    %c0_13 = arith.constant 0 : index
    %c0_14 = arith.constant 0 : index
    %16 = vector.load %arg6[%c0_13, %c0_14] : memref<8x128xbf16, #tpu.memory_space<vmem>>, vector<8x128xbf16>
    %cst_15 = arith.constant dense<0.000000e+00> : vector<1x128xf32>
    %17 = tpu.matmul %15, %16, %cst_15 {dimension_numbers = #tpu.dot_dimension_numbers<[1], [0], [0], [1], [0, 0, 1, 1], [], []>} : vector<1x8xbf16>, vector<8x128xbf16>, vector<1x128xf32> -> vector<1x128xf32>
    %c0_16 = arith.constant 0 : index
    %c0_17 = arith.constant 0 : index
    %18 = vector.load %arg7[%c0_16, %c0_17] : memref<1x128xf32, #tpu.memory_space<vmem>>, vector<1x128xf32>
    %19 = arith.addf %17, %18 : vector<1x128xf32>
    %20 = vector.shape_cast %19 : vector<1x128xf32> to vector<1x1x128xf32>
    %21 = vector.shape_cast %20 : vector<1x1x128xf32> to vector<1x1x128xf32>
    %22 = vector.broadcast %21 : vector<1x1x128xf32> to vector<1x16x128xf32>
    %c0_18 = arith.constant 0 : index
    %c0_19 = arith.constant 0 : index
    %c0_20 = arith.constant 0 : index
    %23 = vector.load %arg8[%c0_18, %c0_19, %c0_20] : memref<1x16x128xf32, #tpu.memory_space<vmem>>, vector<1x16x128xf32>
    tpu.vector_store %arg8[%c0_18, %c0_19, %c0_20], %22 {strides = array<i32>} : memref<1x16x128xf32, #tpu.memory_space<vmem>>, vector<1x16x128xf32>,
    return
  }
  func.func @transform_0(%arg0: i32) -> (i32, i32, i32) {
    %c0_i32 = arith.constant 0 : i32
    %c0_i32_0 = arith.constant 0 : i32
    %c0_i32_1 = arith.constant 0 : i32
    return %arg0, %c0_i32, %c0_i32_0 : i32, i32, i32
  }
  func.func @transform_1(%arg0: i32) -> (i32, i32) {
    %c0_i32 = arith.constant 0 : i32
    %c0_i32_0 = arith.constant 0 : i32
    %c0_i32_1 = arith.constant 0 : i32
    return %c0_i32, %c0_i32_0 : i32, i32
  }
  func.func @transform_2(%arg0: i32) -> (i32, i32) {
    %c0_i32 = arith.constant 0 : i32
    %c0_i32_0 = arith.constant 0 : i32
    %c0_i32_1 = arith.constant 0 : i32
    return %c0_i32, %c0_i32_0 : i32, i32
  }
  func.func @transform_3(%arg0: i32) -> (i32, i32) {
    %c0_i32 = arith.constant 0 : i32
    %c0_i32_0 = arith.constant 0 : i32
    %c0_i32_1 = arith.constant 0 : i32
    return %c0_i32, %c0_i32_0 : i32, i32
  }
  func.func @transform_4(%arg0: i32) -> (i32, i32) {
    %c0_i32 = arith.constant 0 : i32
    %c0_i32_0 = arith.constant 0 : i32
    %c0_i32_1 = arith.constant 0 : i32
    return %c0_i32, %c0_i32_0 : i32, i32
  }
  func.func @transform_5(%arg0: i32) -> (i32, i32) {
    %c0_i32 = arith.constant 0 : i32
    %c0_i32_0 = arith.constant 0 : i32
    %c0_i32_1 = arith.constant 0 : i32
    return %c0_i32, %c0_i32_0 : i32, i32
  }
  func.func @transform_6(%arg0: i32) -> (i32, i32) {
    %c0_i32 = arith.constant 0 : i32
    %c0_i32_0 = arith.constant 0 : i32
    %c0_i32_1 = arith.constant 0 : i32
    return %c0_i32, %c0_i32_0 : i32, i32
  }
  func.func @transform_7(%arg0: i32) -> (i32, i32, i32) {
    %c0_i32 = arith.constant 0 : i32
    %c0_i32_0 = arith.constant 0 : i32
    %c0_i32_1 = arith.constant 0 : i32
    return %arg0, %c0_i32, %c0_i32_0 : i32, i32, i32
  }
}

</mosaic_0001>

<bundles_post_ra>
// kernel: tpu_custom_call.1
= control target key start
LH: loop header
LB: loop body
LE: loop exit
PB: predicated region body
PF: predicated region fallthrough
CT: control target
= control target key end

     0   :  { %12 = vsyncpa [#allocation3], 0  ;;  %s736_s0 = inlined_call_operand.vmem [shape: bf16[2,16,4], index: 0, kind: input, shape index: {}]   ;;  %s737_s1 = inlined_call_operand.vmem [shape: bf16[4,8], index: 1, kind: input, shape index: {}]   ;;  %s738_s2 = inlined_call_operand.vmem [shape: f32[1,8], index: 2, kind: input, shape index: {}]   ;;  %s739_s3 = inlined_call_operand.vmem [shape: bf16[8,8], index: 3, kind: input, shape index: {}]   ;;  %s740_s4 = inlined_call_operand.vmem [shape: f32[1,8], index: 4, kind: input, shape index: {}]   ;;  %s741_s5 = inlined_call_operand.vmem [shape: bf16[8,128], index: 5, kind: input, shape index: {}]   ;;  %s742_s6 = inlined_call_operand.vmem [shape: f32[1,128], index: 6, kind: input, shape index: {}]   ;;  %s743_s7 = inlined_call_operand.hbm [shape: f32[2,16,128], index: 7, kind: output, shape index: {}]  }
   0x1   :  { %14 = vsyncpa [#allocation3 + $0x1], 0  ;;  %s627_s24 = smov 0   ;;  %s629_s25 = smov 0  }
   0x2   :  { %s631_s26 = smov 0   ;;  %s633_s27 = smov 0  }
   0x3 LB: > { %s648_s28 = sadd.s32 4294967295, %s582_s27   ;;  %s454_s29 = sadd.s32 4294967294, %s582_s27   ;;  %s582_s27 = sphi %s633_s27, %s749_s27   ;;  %s578_s26 = sphi %s631_s26, %s748_s26   ;;  %s574_s25 = sphi %s629_s25, %s747_s25   ;;  %s570_s24 = sphi %s627_s24, %s746_s24  }
   0x4   : > { %s652_s30 = sadd.s32 1, %s582_s27   ;;  %s179_s8 = sadd.s32 1, %s578_s26 }
   0x5   : > { %s176_s9 = ssub.s32 %s582_s27, %s652_s30  ;;  %p189_p0 = scmp.ne.s32.totalorder %s578_s26, %s574_s25 }
   0x6   : > { %p177_p1 = scmp.eq.s32.totalorder %s176_s9, 0  ;;  %p190_p2 = scmp.eq.s32.totalorder %s648_s28, 1 }
   0x7   : > { %p195_p3 = scmp.ne.s32.totalorder %s574_s25, %s570_s24  ;;  %p196_p4 = scmp.eq.s32.totalorder %s454_s29, 1 }
   0x8   : > { %s663_s10 = scalar_select %p177_p1, %s578_s26, %s179_s8  }
   0x9   : > { %p665_p5 = por %p190_p2, %p189_p0  ;;  %p669_p6 = por %p196_p4, %p195_p3 }
   0xa   : > { %p457_p7 = scmp.ge.s32.totalorder %s582_s27, 1  ;;  %p240_p8 = scmp.lt.s32.totalorder %s582_s27, 3 }
   0xc   : > { %p241_p9 = pnand %p457_p7, %p240_p8 }
   0xd   : > { %p272_p10 = scmp.lt.s32.totalorder (!%p241_p9), %s648_s28, 1  ;;  %s269_s14 = sand.u32 (!%p241_p9), 1, %s574_s25  }
   0xe   : > { %244 = sbr.rel (%p241_p9) target bundleno = 450 (0x1c2), region = 48 }
  0x13   : > { %v280_v0 = vld [vmem:[%s737_s1] sm:$0x3]  ;;  %vm290_vm0 = vcmask 1041408   ;;  %s273_s15 = scalar_select %p272_p10, %s648_s28, 1  ;;  %vm286_vm1 = vcmask 31744   ;;  %vm334_vm2 = vcmask 1043456  }
  0x14   : > { %v292_v1 = vsel %vm290_vm0, %v280_v0, 0  ;;  %v329_v3 = vld [vmem:[%s739_s3] sm:$0xf]  ;;  %v584_v5 = vmov 16.0   ;;  %vm308_vm3 = vcmask 64512  }
  0x15   : > { %301 = vmatpush.bf16.msra.mxu0 %v292_v1  ;;  %s473_s16 = sshll.u32 %s273_s15, 3  ;;  %v336_v4 = vsel %vm334_vm2, %v329_v3, 0  ;;  %518 = vrcp.f32 %v584_v5  ;;  %v326_v23 = vld [vmem:[%s738_s2] sm:$0x1]  ;;  %s458_s15 = sshll.u32 %s269_s14, 4 }
  0x16   : > { %s276_s19 = scalar_lea.vmem %s736_s0, %s473_s16  ;;  %345 = vmatpush.bf16.msra.mxu1 %v336_v4  ;;  %v352_v27 = vld [vmem:[%s741_s5] sm:$0xf]  ;;  %s475_s16 = sshll.u32 %s648_s28, 4 }
  0x17   : > { %v474_v2 = vld [vmem:[%s276_s19] sm:$0xff]  ;;  %v358_v28 = vsel %vm334_vm2, %v352_v27, 0  ;;  %s388_s21 = scalar_lea.hbm %s743_s7, %s475_s16  ;;  %s271_s22 = scalar_lea.vmem [#allocation2], %s458_s15 }
  0x18   : > { %465 = vmatmul.msk.bf16.vlgmr.msra.gmra.mxu0 %vm286_vm1, %v474_v2  ;;  %367 = vmatpush.bf16.msra.mxu2 %v358_v28  ;;  %v330_v29 = vld [vmem:[%s740_s4] sm:$0x1]  ;;  %s389_s23 = sshll.u32 %s271_s22, 4  ;;  %s391_s29 = sshll.u32 %s388_s21, 4  ;;  %s390_s23 = int_to_ptr.vmem [resolvable:$true] %s389_s23  ;;  %s392_s29 = int_to_ptr.hbm [resolvable:$true] %s391_s29 }
  0x19   : > { %v353_v34 = vld [vmem:[%s742_s6] sm:$0x1]  ;;  %s377_s28 = scalar_lea.sflag [#allocation3], %s269_s14  ;;  %s534_s8 = sshra.s32 %s392_s29, 4  ;;  %s535_s8 = int_to_ptr.hbm [resolvable:$true] %s534_s8 }
  0x1a   : > { %s536_s9 = scalar_lea.hbm %s535_s8, 16  ;;  %s540_s15 = scalar_lea.hbm %s743_s7, 32 }
  0x1b   : > { %v519_v7 = vpop.eup %518  ;;  %p537_p11 = scmp.ne.s32.totalorder %s535_s8, %s536_s9  ;;  %p541_p0 = scmp.lt.s32.totalorder %s535_s8, %s743_s7 }
  0x1c   : > { %v319_v8 = vmul.f32 16.0, %v519_v7  ;;  %vm323_vm4 = vweird.f32 %v519_v7  ;;  %p542_p1 = scmp.lt.s32.totalorder %s540_s15, %s536_s9 }
  0x1d   : > { %p538_p12 = pnand %p537_p11, %p665_p5 }
  0x1e   : > { %v320_v12 = vsub.f32 1.0, %v319_v8  ;;  %p543_p2 = por %p542_p1, %p541_p0 }
  0x1f   : > { %p539_p13 = pneg %p538_p12 }
  0x20   : > { %v321_v15 = vmul.f32 %v519_v7, %v320_v12 }
  0x21   : > { %p544_p3 = pnand %p543_p2, %p539_p13 }
  0x22   : > { %v322_v18 = vadd.f32 %v519_v7, %v321_v15 }
  0x24   : > { %v324_v21 = vsel %vm323_vm4, %v519_v7, %v322_v18 }
  0x95   : > { %v303_v6 = vpop.f32.mrf.mxu0 }
  0x96   : > { %v309_v10 = vsel %vm308_vm3, %v303_v6, 0.0 }
  0x9d   : > { %v305_v9 = vpop.f32.mrf.mxu0 }
  0x9e   : > { %v310_v11 = vsel %vm308_vm3, %v305_v9, 0.0 }
  0x9f   : > { %v311_v13 = vadd.f32 %v310_v11, %v309_v10 }
  0xa1   : > { %v312_v14 = vrot.slane %v311_v13, 4 }
  0xa3   : > { %v313_v16 = vadd.f32 %v312_v14, %v311_v13 }
  0xa5   : > { %v314_v17 = vrot.slane %v313_v16, 2 }
  0xa7   : > { %v315_v19 = vadd.f32 %v314_v17, %v313_v16 }
  0xa9   : > { %v316_v20 = vrot.slane %v315_v19, 1 }
  0xab   : > { %v317_v22 = vadd.f32 %v316_v20, %v315_v19 }
  0xad   : > { %v325_v24 = vmul.f32 %v324_v21, %v317_v22 }
  0xaf   : > { %v327_v25 = vadd.f32 %v326_v23, %v325_v24 }
  0xb1   : > { %v328_v26 = vpack.c.bf16 %v327_v25, %v327_v25 }
  0xb3   : > { %466 = vmatmul.msk.bf16.vlgmr.msra.gmra.mxu1 %vm308_vm3, %v328_v26 }
 0x130   : > { %v347_v30 = vpop.f32.mrf.mxu1 }
 0x131   : > { %v348_v31 = vadd.f32 %v347_v30, %v330_v29 }
 0x133   : > { %v351_v32 = vpack.c.bf16 %v348_v31, %v348_v31 }
 0x135   : > { %467 = vmatmul.msk.bf16.vlgmr.msra.gmra.mxu2 %vm308_vm3, %v351_v32 }
 0x138   : > { %v349_v33 = vpop.f32.mrf.mxu1 }
 0x1b8   : > { %v369_v35 = vpop.f32.mrf.mxu2 }
 0x1b9   : > { %v370_v36 = vadd.f32 %v369_v35, %v353_v34 }
 0x1bb   : > { %v373_v37 = vperm.slane %v370_v36, 0 }
 0x1bd   : > { %374 = vst [vmem:[%s271_s22] sm:$0xff] %v373_v37 }
 0x1be   : > { %375 = vst [vmem:[%s271_s22 + $0x8] sm:$0xff] %v373_v37 }
 0x1bf   : > { %547 = shalt.err (!%p544_p3)
}
 0x1c0   : > { %s585_s14 = smov 128   ;;  %s586_s19 = smov 8   ;;  %v371_v38 = vpop.f32.mrf.mxu2 }
 0x1c1   : > { %476 = dma.vmem_to_hbm [thread:$0]  (%p665_p5), %s390_s23, 256, %s392_s29, %s377_s28, %s585_s14, %s585_s14, %s586_s19  }
 0x1c2 PF: > { %p482_p4 = scmp.ge.s32.totalorder %s582_s27, 2  ;;  %s406_s20 = sand.u32 1, %s570_s24  }
 0x1c3   : > { %s407_s21 = scalar_lea.sflag [#allocation3], %s406_s20 }
 0x1c4   : > { %p479_p7 = pnand %p482_p4, %p669_p6 }
 0x1c6   : > { %p480_p8 = pneg %p479_p7 }
 0x1c8   : > { %565 = dma.done.wait (%p480_p8), %s407_s21, 256  }
 0x1c9   : > { %567 = vsyncadd (%p480_p8), %s407_s21, 4294967040  ;;  %p17_p9 = scmp.ge.s32.totalorder %s652_s30, 4   ;;  %s746_s24 = smov %s574_s25 }
 0x1ca   : > { %s747_s25 = smov %s578_s26  ;;  %s748_s26 = smov %s663_s10 }
 0x1cb   : > { %s749_s27 = smov %s652_s30  ;;  %19 = sbr.rel (!%p17_p9) target bundleno = 3 (0x3), region = 83 }
 0x1d0   :  { %413 = vsyncpa [#allocation3], 1 }
 0x1d1   :  { %415 = vsyncpa [#allocation3 + $0x1], 1 }

</bundles_post_ra>
